<compile_context>
chip_gen: v6e
topology: v6e:2x2x1
jax: 0.10.0
libtpu: 0.0.40
codegen_flags: <defaults>
</compile_context>

<pallas_src>
import numpy as np
import jax
import jax.numpy as jnp
from jax.experimental import pallas as pl
from jax.experimental.pallas import tpu as pltpu


# ---------------------------------------------------------------------------
# helpers
# ---------------------------------------------------------------------------
def _round_up(n, m):
    return ((n + m - 1) // m) * m


def _pick_batch_block(batch, seq_padded, target_rows=256):
    """Batch elements folded per grid step.

    Targets >=~256 matmul rows per step (v6e/v7x systolic depth; 128 already
    fine on v5e) but caps at batch//2 so the grid has at least two steps and
    both v7x TensorCores get work.  Bb does NOT need to divide batch -- the
    wrapper pads the batch instead (avoids degrading to tiny row blocks for
    awkward / prime batch sizes).
    """
    rows_cap = max(1, target_rows // max(seq_padded, 1))
    core_cap = max(1, batch // 2) if batch >= 2 else 1
    return max(1, min(rows_cap, core_cap, batch))


def _invariant_spec(block_shape):
    """Grid-invariant operand (constant block index every step).

    Single-buffer it: double-buffering a constant block wastes VMEM and DMA
    bookkeeping with zero overlap benefit.  Falls back to the default spec if
    this JAX build does not accept pipeline_mode.
    """
    index_map = lambda i: (0,) * len(block_shape)
    if hasattr(pl, "Buffered"):
        try:
            return pl.BlockSpec(block_shape, index_map,
                                pipeline_mode=pl.Buffered(1))
        except TypeError:
            pass
    return pl.BlockSpec(block_shape, index_map)


# ---------------------------------------------------------------------------
# one-time weight preparation (cacheable; NOT on the per-call path)
# ---------------------------------------------------------------------------
def prepare_params(params, *, compute_dtype=jnp.bfloat16):
    """Pad/transpose/fuse the model weights once.  Returns device arrays only."""
    D = params["lin_w"].shape[0]
    Dp = _round_up(max(D, 128), 128)            # lane-dense embed width
    scale = 1.0 / float(np.sqrt(D))             # num_heads == 1 -> head_dim == D

    def pad2(w):   # torch layout (out, in) -> transposed & zero-padded (Dp, Dp)
        return jnp.pad(w.T, ((0, Dp - w.shape[1]), (0, Dp - w.shape[0])))

    def pad1(v):
        return jnp.pad(v, (0, Dp - v.shape[0]))

    wq, wk, wv = jnp.split(params["in_proj_w"], 3, axis=0)
    bq, bk, bv = jnp.split(params["in_proj_b"], 3)

    # Fold the 1/sqrt(D) attention scale into Wq / bq (one-time weight
    # transform, NOT a per-call activation pre-scale).
    w_all = jnp.concatenate(
        [pad2(wq) * scale, pad2(wk), pad2(wv),
         pad2(params["out_proj_w"]), pad2(params["lin_w"])],
        axis=1).astype(compute_dtype)                                  # (Dp, 5Dp)

    # packed vector slab: rows = bq*scale, bk, bv, bo, gamma, beta, bl, 0
    vecs = jnp.stack([
        pad1(bq) * scale, pad1(bk), pad1(bv),
        pad1(params["out_proj_b"]),
        pad1(params["ln_gamma"]), pad1(params["ln_beta"]),
        pad1(params["lin_b"]),
        jnp.zeros((Dp,), jnp.float32),
    ]).astype(jnp.float32)                                             # (8, Dp)

    pe = jnp.pad(params["pe"].astype(jnp.float32),
                 ((0, 0), (0, Dp - D)))                                # (max_len, Dp)

    return {"w_all": w_all, "vecs": vecs, "pe": pe}


# ---------------------------------------------------------------------------
# forward (per-call): only activation padding + the pallas_call
# ---------------------------------------------------------------------------
def multilayer_attention_forward(x, prepped):
    """x: (B, S, D) float32.  prepped: output of prepare_params."""
    B, S, D = x.shape
    w_all, vecs, pe_full = prepped["w_all"], prepped["vecs"], prepped["pe"]
    Dp = w_all.shape[0]
    cdt = w_all.dtype
    exact_recip = (cdt == jnp.float32)          # exact softmax on validation path

    Sp = _round_up(S, 8)                        # keep reshapes (8,128)-preserving
    Bb = _pick_batch_block(B, Sp)
    n_steps = pl.cdiv(B, Bb)
    Bp = n_steps * Bb
    inv_d = 1.0 / float(D)

    # per-call activation layout plumbing (cheap; fuses under jit)
    x_p = jnp.pad(x.astype(jnp.float32),
                  ((0, Bp - B), (0, Sp - S), (0, Dp - D)))             # (Bp,Sp,Dp)
    pe_p = jnp.pad(pe_full[:B], ((0, Bp - B), (0, 0)))[:, None, :]     # (Bp,1,Dp)

    # ---- kernel ------------------------------------------------------------
    def kernel(x_ref, pe_ref, w_ref, vec_ref, o_ref):
        vecs_v = vec_ref[...]                              # (8, Dp) f32

        # positional encoding: pe[b] broadcast over all sequence positions
        x_f32 = x_ref[...] + pe_ref[...]                   # (Bb, Sp, Dp) f32
        x2 = x_f32.reshape(Bb * Sp, Dp)                    # residual operand (f32)
        xc = x2.astype(cdt)

        # fused QKV projection: one MXU pass, f32 accumulation
        qkv = jnp.dot(xc, w_ref[:, 0:3 * Dp], preferred_element_type=jnp.float32)
        q = (qkv[:, 0 * Dp:1 * Dp] + vecs_v[0:1]).reshape(Bb, Sp, Dp).astype(cdt)
        k = (qkv[:, 1 * Dp:2 * Dp] + vecs_v[1:2]).reshape(Bb, Sp, Dp).astype(cdt)
        v = (qkv[:, 2 * Dp:3 * Dp] + vecs_v[2:3]).reshape(Bb, Sp, Dp).astype(cdt)

        # scaled dot-product attention (scale already folded into Wq/bq);
        # batched dot_general avoids an explicit k transpose.
        s = jnp.einsum("bqd,bkd->bqk", q, k,
                       preferred_element_type=jnp.float32)             # (Bb,Sp,Sp)
        if Sp != S:   # mask padded key positions (static condition)
            key_mask = jax.lax.broadcasted_iota(jnp.int32, (1, 1, Sp), 2) < S
            s = jnp.where(key_mask, s, -1e30)
        m = jnp.max(s, axis=-1, keepdims=True)
        p = jnp.exp(s - m)
        l = jnp.sum(p, axis=-1, keepdims=True)
        if exact_recip:
            attn = p / l                                   # exact (validation path)
        else:
            attn = p * pl.reciprocal(l, approx=True)       # EUP vrcp (free slot)
        # TODO(synk): attention dropout (p=0.1) omitted -- eval/inference semantics.
        # TODO(synk): for long sequences switch to a flash-style KV-tiled online
        # softmax; the whole-row (Bb,Sp,Sp) f32 score tensor blows the scoped
        # VMEM budget around S~2.5-3k on v7x (64 MiB) vs ~4k on v5e/v6e (128 MiB).
        ctx = jnp.einsum("bqk,bkd->bqd", attn.astype(cdt), v,
                         preferred_element_type=jnp.float32)           # (Bb,Sp,Dp)

        # output projection + ELU(alpha=1)
        ao = jnp.dot(ctx.reshape(Bb * Sp, Dp).astype(cdt), w_ref[:, 3 * Dp:4 * Dp],
                     preferred_element_type=jnp.float32) + vecs_v[3:4]
        ao = jnp.where(ao > 0.0, ao, jnp.exp(ao) - 1.0)

        # residual (f32)
        y = ao + x2

        # LayerNorm over the REAL embed width D (padded lanes of y are exactly
        # zero, so plain lane sums give correct statistics; eps = 1e-5).
        mu = jnp.sum(y, axis=-1, keepdims=True) * inv_d
        var = jnp.sum(y * y, axis=-1, keepdims=True) * inv_d - mu * mu
        var = jnp.maximum(var, 0.0)                        # guard cancellation
        yn = (y - mu) * jax.lax.rsqrt(var + 1e-5)
        yn = yn * vecs_v[4:5] + vecs_v[5:6]                # gamma, beta (zero-padded)

        # final Linear(D, D)
        out = jnp.dot(yn.astype(cdt), w_ref[:, 4 * Dp:5 * Dp],
                      preferred_element_type=jnp.float32) + vecs_v[6:7]
        o_ref[...] = out.reshape(Bb, Sp, Dp)

    out_p = pl.pallas_call(
        kernel,
        out_shape=jax.ShapeDtypeStruct((Bp, Sp, Dp), jnp.float32),
        grid_spec=pltpu.PrefetchScalarGridSpec(
            num_scalar_prefetch=0,
            grid=(n_steps,),
            in_specs=[
                pl.BlockSpec((Bb, Sp, Dp), lambda i: (i, 0, 0)),   # x (padded)
                pl.BlockSpec((Bb, 1, Dp), lambda i: (i, 0, 0)),    # pe rows
                _invariant_spec((Dp, 5 * Dp)),                     # fused weight slab
                _invariant_spec((8, Dp)),                          # bias/affine slab
            ],
            out_specs=pl.BlockSpec((Bb, Sp, Dp), lambda i: (i, 0, 0)),
        ),
        compiler_params=pltpu.CompilerParams(
            dimension_semantics=("parallel",),
            vmem_limit_bytes=32 * 1024 * 1024,
        ),
    )(x_p, pe_p, w_all, vecs)

    # Drop batch/seq/lane padding.  (If downstream consumers tolerate the
    # lane-padded layout, return out_p directly and skip this HBM pass.)
    return out_p[:B, :S, :D]


# ---------------------------------------------------------------------------
# parameters / reference
# ---------------------------------------------------------------------------
def make_positional_encoding(max_len, d_model):
    position = np.arange(max_len, dtype=np.float32)[:, None]
    div_term = np.exp(np.arange(0, d_model, 2, dtype=np.float32)
                      * (-np.log(10000.0) / d_model))
    pe = np.zeros((max_len, d_model), dtype=np.float32)
    pe[:, 0::2] = np.sin(position * div_term)
    pe[:, 1::2] = np.cos(position * div_term)
    return jnp.asarray(pe)


def init_params(key, d_model, max_len=5000):
    # Deterministic synthetic init matching nn.MultiheadAttention /
    # nn.LayerNorm / nn.Linear parameter shapes (num_heads=1, num_layers=1).
    ks = jax.random.split(key, 6)
    scale = 1.0 / np.sqrt(d_model)
    return {
        "pe": make_positional_encoding(max_len, d_model),
        "in_proj_w": jax.random.normal(ks[0], (3 * d_model, d_model), jnp.float32) * scale,
        "in_proj_b": jax.random.normal(ks[1], (3 * d_model,), jnp.float32) * 0.02,
        "out_proj_w": jax.random.normal(ks[2], (d_model, d_model), jnp.float32) * scale,
        "out_proj_b": jax.random.normal(ks[3], (d_model,), jnp.float32) * 0.02,
        "ln_gamma": jnp.ones((d_model,), jnp.float32),
        "ln_beta": jnp.zeros((d_model,), jnp.float32),
        "lin_w": jax.random.normal(ks[4], (d_model, d_model), jnp.float32) * scale,
        "lin_b": jax.random.normal(ks[5], (d_model,), jnp.float32) * 0.02,
    }


def reference_forward(x, params):
    # Pure-JAX f32 reference of the PyTorch forward (eval mode).
    B, S, D = x.shape
    x = x + params["pe"][:B][:, None, :]                 # pe broadcast over seq
    xt = jnp.transpose(x, (1, 0, 2))                     # (S, B, D)
    wq, wk, wv = jnp.split(params["in_proj_w"], 3, axis=0)
    bq, bk, bv = jnp.split(params["in_proj_b"], 3)
    q = xt @ wq.T + bq
    k = xt @ wk.T + bk
    v = xt @ wv.T + bv
    s = jnp.einsum("sbd,tbd->bst", q, k) / jnp.sqrt(jnp.float32(D))
    a = jax.nn.softmax(s, axis=-1)
    ctx = jnp.einsum("bst,tbd->sbd", a, v)
    ao = ctx @ params["out_proj_w"].T + params["out_proj_b"]
    ao = jnp.where(ao > 0, ao, jnp.exp(ao) - 1.0)
    y = ao + xt
    mu = jnp.mean(y, -1, keepdims=True)
    var = jnp.mean((y - mu) ** 2, -1, keepdims=True)
    y = (y - mu) / jnp.sqrt(var + 1e-5) * params["ln_gamma"] + params["ln_beta"]
    y = jnp.transpose(y, (1, 0, 2))
    return y @ params["lin_w"].T + params["lin_b"]


# ---------------------------------------------------------------------------
if __name__ == "__main__":
    B, S, D = 2, 8, 32
    key = jax.random.PRNGKey(0)
    kx, kp = jax.random.split(key)
    x = jax.random.normal(kx, (B, S, D), jnp.float32)
    params = init_params(kp, D)

    ref = reference_forward(x, params)

    fwd = jax.jit(multilayer_attention_forward)

    # f32 compute path with EXACT softmax reciprocal: validates semantics.
    prepped_f32 = prepare_params(params, compute_dtype=jnp.float32)
    out_f32 = jax.block_until_ready(fwd(x, prepped_f32))
    np.testing.assert_allclose(np.asarray(out_f32), np.asarray(ref),
                               rtol=1e-2, atol=1e-2)

    # bf16 MXU operands / f32 accumulation (approx EUP reciprocal): perf config.
    prepped_bf16 = prepare_params(params, compute_dtype=jnp.bfloat16)
    out_bf16 = jax.block_until_ready(fwd(x, prepped_bf16))
    np.testing.assert_allclose(np.asarray(out_bf16), np.asarray(ref),
                               rtol=1e-1, atol=1e-1)

    print("KERNEL_OK")
</pallas_src>

<mosaic_0001>
module attributes {stable_mosaic.version = 11 : i64} {
  func.func @kernel(%arg0: i32, %arg1: memref<1x8x128xf32, #tpu.memory_space<vmem>>, %arg2: memref<1x1x128xf32, #tpu.memory_space<vmem>>, %arg3: memref<128x640xf32, #tpu.memory_space<vmem>>, %arg4: memref<8x128xf32, #tpu.memory_space<vmem>>, %arg5: memref<1x8x128xf32, #tpu.memory_space<vmem>>) attributes {dimension_semantics = [#tpu.dimension_semantics<parallel>], iteration_bounds = array<i64: 2>, scalar_prefetch = 0 : i64, scratch_operands = 0 : i64, tpu.core_type = #tpu.core_type<tc>, window_params = [{transform_indices = @transform_0, window_bounds = array<i64: 1, 8, 128>}, {transform_indices = @transform_1, window_bounds = array<i64: 1, 1, 128>}, {pipeline_mode = #tpu.pipeline_mode<synchronous>, transform_indices = @transform_2, window_bounds = array<i64: 128, 640>}, {pipeline_mode = #tpu.pipeline_mode<synchronous>, transform_indices = @transform_3, window_bounds = array<i64: 8, 128>}, {transform_indices = @transform_4, window_bounds = array<i64: 1, 8, 128>}]} {
    %c0 = arith.constant 0 : index
    %c0_0 = arith.constant 0 : index
    %0 = vector.load %arg4[%c0, %c0_0] : memref<8x128xf32, #tpu.memory_space<vmem>>, vector<8x128xf32>
    %c0_1 = arith.constant 0 : index
    %c0_2 = arith.constant 0 : index
    %c0_3 = arith.constant 0 : index
    %1 = vector.load %arg1[%c0_1, %c0_2, %c0_3] : memref<1x8x128xf32, #tpu.memory_space<vmem>>, vector<1x8x128xf32>
    %c0_4 = arith.constant 0 : index
    %c0_5 = arith.constant 0 : index
    %c0_6 = arith.constant 0 : index
    %2 = vector.load %arg2[%c0_4, %c0_5, %c0_6] : memref<1x1x128xf32, #tpu.memory_space<vmem>>, vector<1x1x128xf32>
    %3 = vector.broadcast %2 : vector<1x1x128xf32> to vector<1x8x128xf32>
    %4 = arith.addf %1, %3 : vector<1x8x128xf32>
    %5 = vector.shape_cast %4 : vector<1x8x128xf32> to vector<8x128xf32>
    %c0_7 = arith.constant 0 : index
    %c0_8 = arith.constant 0 : index
    %6 = vector.load %arg3[%c0_7, %c0_8] : memref<128x640xf32, #tpu.memory_space<vmem>>, vector<128x384xf32>
    %cst = arith.constant dense<0.000000e+00> : vector<8x384xf32>
    %7 = tpu.matmul %5, %6, %cst {dimension_numbers = #tpu.dot_dimension_numbers<[1], [0], [0], [1], [0, 0, 1, 1], [], []>} : vector<8x128xf32>, vector<128x384xf32>, vector<8x384xf32> -> vector<8x384xf32>
    %8 = vector.extract_strided_slice %7 {offsets = [0, 0], sizes = [8, 128], strides = [1, 1]} : vector<8x384xf32> to vector<8x128xf32>
    %9 = vector.extract_strided_slice %0 {offsets = [0, 0], sizes = [1, 128], strides = [1, 1]} : vector<8x128xf32> to vector<1x128xf32>
    %10 = vector.broadcast %9 : vector<1x128xf32> to vector<8x128xf32>
    %11 = arith.addf %8, %10 : vector<8x128xf32>
    %12 = vector.shape_cast %11 : vector<8x128xf32> to vector<1x8x128xf32>
    %13 = vector.extract_strided_slice %7 {offsets = [0, 128], sizes = [8, 128], strides = [1, 1]} : vector<8x384xf32> to vector<8x128xf32>
    %14 = vector.extract_strided_slice %0 {offsets = [1, 0], sizes = [1, 128], strides = [1, 1]} : vector<8x128xf32> to vector<1x128xf32>
    %15 = vector.broadcast %14 : vector<1x128xf32> to vector<8x128xf32>
    %16 = arith.addf %13, %15 : vector<8x128xf32>
    %17 = vector.shape_cast %16 : vector<8x128xf32> to vector<1x8x128xf32>
    %18 = vector.extract_strided_slice %7 {offsets = [0, 256], sizes = [8, 128], strides = [1, 1]} : vector<8x384xf32> to vector<8x128xf32>
    %19 = vector.extract_strided_slice %0 {offsets = [2, 0], sizes = [1, 128], strides = [1, 1]} : vector<8x128xf32> to vector<1x128xf32>
    %20 = vector.broadcast %19 : vector<1x128xf32> to vector<8x128xf32>
    %21 = arith.addf %18, %20 : vector<8x128xf32>
    %22 = vector.shape_cast %21 : vector<8x128xf32> to vector<1x8x128xf32>
    "tpu.trace_start"() <{level = 10 : i32, message = "bqd,bkd->bqk"}> : () -> ()
    %cst_9 = arith.constant dense<0.000000e+00> : vector<1x8x8xf32>
    %23 = tpu.matmul %12, %17, %cst_9 {dimension_numbers = #tpu.dot_dimension_numbers<[2], [2], [1], [1], [0, 0, 0, 1, 1, 1], [0], [0]>} : vector<1x8x128xf32>, vector<1x8x128xf32>, vector<1x8x8xf32> -> vector<1x8x8xf32>
    "tpu.trace_stop"() : () -> ()
    %cst_10 = arith.constant dense<0xFF800000> : vector<1x8xf32>
    %24 = vector.multi_reduction <maximumf>, %23, %cst_10 [2] : vector<1x8x8xf32> to vector<1x8xf32>
    %25 = vector.shape_cast %24 : vector<1x8xf32> to vector<1x8x1xf32>
    %26 = vector.broadcast %25 : vector<1x8x1xf32> to vector<1x8x8xf32>
    %27 = arith.subf %23, %26 : vector<1x8x8xf32>
    %28 = math.exp %27 : vector<1x8x8xf32>
    %cst_11 = arith.constant dense<0.000000e+00> : vector<1x8xf32>
    %29 = vector.multi_reduction <add>, %28, %cst_11 [2] : vector<1x8x8xf32> to vector<1x8xf32>
    %30 = vector.shape_cast %29 : vector<1x8xf32> to vector<1x8x1xf32>
    %31 = vector.broadcast %30 : vector<1x8x1xf32> to vector<1x8x8xf32>
    %32 = arith.divf %28, %31 : vector<1x8x8xf32>
    "tpu.trace_start"() <{level = 10 : i32, message = "bqk,bkd->bqd"}> : () -> ()
    %cst_12 = arith.constant dense<0.000000e+00> : vector<1x8x128xf32>
    %33 = tpu.matmul %32, %22, %cst_12 {dimension_numbers = #tpu.dot_dimension_numbers<[2], [1], [1], [2], [0, 0, 0, 1, 1, 2], [0], [0]>} : vector<1x8x8xf32>, vector<1x8x128xf32>, vector<1x8x128xf32> -> vector<1x8x128xf32>
    "tpu.trace_stop"() : () -> ()
    %34 = vector.shape_cast %33 : vector<1x8x128xf32> to vector<8x128xf32>
    %c0_13 = arith.constant 0 : index
    %c384 = arith.constant 384 : index
    %35 = vector.load %arg3[%c0_13, %c384] : memref<128x640xf32, #tpu.memory_space<vmem>>, vector<128x128xf32>
    %cst_14 = arith.constant dense<0.000000e+00> : vector<8x128xf32>
    %36 = tpu.matmul %34, %35, %cst_14 {dimension_numbers = #tpu.dot_dimension_numbers<[1], [0], [0], [1], [0, 0, 1, 1], [], []>} : vector<8x128xf32>, vector<128x128xf32>, vector<8x128xf32> -> vector<8x128xf32>
    %37 = vector.extract_strided_slice %0 {offsets = [3, 0], sizes = [1, 128], strides = [1, 1]} : vector<8x128xf32> to vector<1x128xf32>
    %38 = vector.broadcast %37 : vector<1x128xf32> to vector<8x128xf32>
    %39 = arith.addf %36, %38 : vector<8x128xf32>
    %cst_15 = arith.constant 0.000000e+00 : f32
    %40 = vector.broadcast %cst_15 : f32 to vector<8x128xf32>
    %41 = arith.cmpf ogt, %39, %40 : vector<8x128xf32>
    %42 = math.exp %39 : vector<8x128xf32>
    %cst_16 = arith.constant 1.000000e+00 : f32
    %43 = vector.broadcast %cst_16 : f32 to vector<8x128xf32>
    %44 = arith.subf %42, %43 : vector<8x128xf32>
    %45 = arith.select %41, %39, %44 : vector<8x128xi1>, vector<8x128xf32>
    %46 = arith.addf %45, %5 : vector<8x128xf32>
    %cst_17 = arith.constant dense<0.000000e+00> : vector<8xf32>
    %47 = vector.multi_reduction <add>, %46, %cst_17 [1] : vector<8x128xf32> to vector<8xf32>
    %48 = vector.shape_cast %47 : vector<8xf32> to vector<8x1xf32>
    %cst_18 = arith.constant 3.125000e-02 : f32
    %49 = vector.broadcast %cst_18 : f32 to vector<8x1xf32>
    %50 = arith.mulf %48, %49 : vector<8x1xf32>
    %51 = arith.mulf %46, %46 : vector<8x128xf32>
    %cst_19 = arith.constant dense<0.000000e+00> : vector<8xf32>
    %52 = vector.multi_reduction <add>, %51, %cst_19 [1] : vector<8x128xf32> to vector<8xf32>
    %53 = vector.shape_cast %52 : vector<8xf32> to vector<8x1xf32>
    %cst_20 = arith.constant 3.125000e-02 : f32
    %54 = vector.broadcast %cst_20 : f32 to vector<8x1xf32>
    %55 = arith.mulf %53, %54 : vector<8x1xf32>
    %56 = arith.mulf %50, %50 : vector<8x1xf32>
    %57 = arith.subf %55, %56 : vector<8x1xf32>
    %cst_21 = arith.constant 0.000000e+00 : f32
    %58 = vector.broadcast %cst_21 : f32 to vector<8x1xf32>
    %59 = arith.maximumf %57, %58 : vector<8x1xf32>
    %60 = vector.broadcast %50 : vector<8x1xf32> to vector<8x128xf32>
    %61 = arith.subf %46, %60 : vector<8x128xf32>
    %cst_22 = arith.constant 9.99999974E-6 : f32
    %62 = vector.broadcast %cst_22 : f32 to vector<8x1xf32>
    %63 = arith.addf %59, %62 : vector<8x1xf32>
    %64 = math.rsqrt %63 : vector<8x1xf32>
    %65 = vector.broadcast %64 : vector<8x1xf32> to vector<8x128xf32>
    %66 = arith.mulf %61, %65 : vector<8x128xf32>
    %67 = vector.extract_strided_slice %0 {offsets = [4, 0], sizes = [1, 128], strides = [1, 1]} : vector<8x128xf32> to vector<1x128xf32>
    %68 = vector.broadcast %67 : vector<1x128xf32> to vector<8x128xf32>
    %69 = arith.mulf %66, %68 : vector<8x128xf32>
    %70 = vector.extract_strided_slice %0 {offsets = [5, 0], sizes = [1, 128], strides = [1, 1]} : vector<8x128xf32> to vector<1x128xf32>
    %71 = vector.broadcast %70 : vector<1x128xf32> to vector<8x128xf32>
    %72 = arith.addf %69, %71 : vector<8x128xf32>
    %c0_23 = arith.constant 0 : index
    %c512 = arith.constant 512 : index
    %73 = vector.load %arg3[%c0_23, %c512] : memref<128x640xf32, #tpu.memory_space<vmem>>, vector<128x128xf32>
    %cst_24 = arith.constant dense<0.000000e+00> : vector<8x128xf32>
    %74 = tpu.matmul %72, %73, %cst_24 {dimension_numbers = #tpu.dot_dimension_numbers<[1], [0], [0], [1], [0, 0, 1, 1], [], []>} : vector<8x128xf32>, vector<128x128xf32>, vector<8x128xf32> -> vector<8x128xf32>
    %75 = vector.extract_strided_slice %0 {offsets = [6, 0], sizes = [1, 128], strides = [1, 1]} : vector<8x128xf32> to vector<1x128xf32>
    %76 = vector.broadcast %75 : vector<1x128xf32> to vector<8x128xf32>
    %77 = arith.addf %74, %76 : vector<8x128xf32>
    %78 = vector.shape_cast %77 : vector<8x128xf32> to vector<1x8x128xf32>
    %c0_25 = arith.constant 0 : index
    %c0_26 = arith.constant 0 : index
    %c0_27 = arith.constant 0 : index
    %79 = vector.load %arg5[%c0_25, %c0_26, %c0_27] : memref<1x8x128xf32, #tpu.memory_space<vmem>>, vector<1x8x128xf32>
    tpu.vector_store %arg5[%c0_25, %c0_26, %c0_27], %78 {strides = array<i32>} : memref<1x8x128xf32, #tpu.memory_space<vmem>>, vector<1x8x128xf32>,
    return
  }
  func.func @transform_0(%arg0: i32) -> (i32, i32, i32) {
    %c0_i32 = arith.constant 0 : i32
    %c0_i32_0 = arith.constant 0 : i32
    %c0_i32_1 = arith.constant 0 : i32
    return %arg0, %c0_i32, %c0_i32_0 : i32, i32, i32
  }
  func.func @transform_1(%arg0: i32) -> (i32, i32, i32) {
    %c0_i32 = arith.constant 0 : i32
    %c0_i32_0 = arith.constant 0 : i32
    %c0_i32_1 = arith.constant 0 : i32
    return %arg0, %c0_i32, %c0_i32_0 : i32, i32, i32
  }
  func.func @transform_2(%arg0: i32) -> (i32, i32) {
    %c0_i32 = arith.constant 0 : i32
    %c0_i32_0 = arith.constant 0 : i32
    %c0_i32_1 = arith.constant 0 : i32
    return %c0_i32, %c0_i32_0 : i32, i32
  }
  func.func @transform_3(%arg0: i32) -> (i32, i32) {
    %c0_i32 = arith.constant 0 : i32
    %c0_i32_0 = arith.constant 0 : i32
    %c0_i32_1 = arith.constant 0 : i32
    return %c0_i32, %c0_i32_0 : i32, i32
  }
  func.func @transform_4(%arg0: i32) -> (i32, i32, i32) {
    %c0_i32 = arith.constant 0 : i32
    %c0_i32_0 = arith.constant 0 : i32
    %c0_i32_1 = arith.constant 0 : i32
    return %arg0, %c0_i32, %c0_i32_0 : i32, i32, i32
  }
}

</mosaic_0001>

<bundles_post_ra>
// kernel: multilayer_attention_forward.1
= control target key start
LH: loop header
LB: loop body
LE: loop exit
PB: predicated region body
PF: predicated region fallthrough
CT: control target
= control target key end

     0   :  { %9 = vsyncpa [#allocation3], 0  ;;  %s1562_s0 = inlined_call_operand.vmem [shape: f32[2,8,128], index: 0, kind: input, shape index: {}]   ;;  %s1563_s1 = inlined_call_operand.vmem [shape: f32[2,1,128], index: 1, kind: input, shape index: {}]   ;;  %s1564_s2 = inlined_call_operand.hbm [shape: f32[128,640], index: 2, kind: input, shape index: {}]   ;;  %s1565_s3 = inlined_call_operand.hbm [shape: f32[8,128], index: 3, kind: input, shape index: {}]   ;;  %s1566_s4 = inlined_call_operand.hbm [shape: f32[2,8,128], index: 4, kind: output, shape index: {}]  }
   0x1   :  { %10 = vsyncpa [#allocation6], 0 }
   0x2   :  { %11 = vsyncpa [#allocation4], 0 }
   0x3   :  { %13 = vsyncpa [#allocation4 + $0x1], 0  ;;  %s1332_s15 = smov 0   ;;  %s1334_s16 = smov 0  }
   0x4   :  { %s1336_s17 = smov 0   ;;  %s1338_s18 = smov 0  }
   0x5 LB: > { %s1353_s19 = sadd.s32 4294967295, %s1298_s18   ;;  %s919_s20 = sadd.s32 4294967294, %s1298_s18   ;;  %s1298_s18 = sphi %s1338_s18, %s1580_s18   ;;  %s1294_s17 = sphi %s1336_s17, %s1579_s17   ;;  %s1290_s16 = sphi %s1334_s16, %s1578_s16   ;;  %s1286_s15 = sphi %s1332_s15, %s1577_s15  }
   0x6   : > { %s1357_s21 = sadd.s32 1, %s1298_s18   ;;  %s120_s22 = sadd.s32 1, %s1294_s17 }
   0x7   : > { %s117_s23 = ssub.s32 %s1298_s18, %s1357_s21  ;;  %p130_p0 = scmp.ne.s32.totalorder %s1294_s17, %s1290_s16 }
   0x8   : > { %p118_p1 = scmp.eq.s32.totalorder %s117_s23, 0  ;;  %p131_p2 = scmp.eq.s32.totalorder %s1353_s19, 1 }
   0x9   : > { %p136_p3 = scmp.ne.s32.totalorder %s1290_s16, %s1286_s15  ;;  %p137_p4 = scmp.eq.s32.totalorder %s919_s20, 1 }
   0xa   : > { %s1368_s24 = scalar_select %p118_p1, %s1294_s17, %s120_s22  }
   0xb   : > { %p1370_p5 = por %p131_p2, %p130_p0  ;;  %p1374_p6 = por %p137_p4, %p136_p3 }
   0xc   : > { %p920_p7 = scmp.ge.s32.totalorder %s1298_s18, 1  ;;  %p144_p8 = scmp.lt.s32.totalorder %s1298_s18, 3 }
   0xd   : > { %s1569_s26 = scalar_select %p1374_p6, 1, 0 }
   0xe   : > { %p1567_p9 = scmp.eq.s32.totalorder %s1353_s19, 0  ;;  %p1381_p10 = pnand %p920_p7, %p144_p8 }
   0xf   : > { %s1300_s28 = smov [#allocation2]   ;;  %s1301_s5 = smov [#allocation5]  }
  0x10   : > { %s156_s29 = sshll.u32 %s1300_s28, 4  ;;  %p1116_p11 = pneg %p1381_p10  ;;  %s157_s29 = int_to_ptr.vmem [resolvable:$true] %s156_s29 }
  0x11   : > { %s170_s6 = sshll.u32 %s1301_s5, 4  ;;  %s1189_s7 = scalar_lea.vmem %s157_s29, 10240  ;;  %s171_s6 = int_to_ptr.vmem [resolvable:$true] %s170_s6 }
  0x12   : > { %p1389_p12 = pnand %p1567_p9, %p1116_p11  ;;  %p1190_p0 = scmp.ne.s32.totalorder %s157_s29, %s1189_s7 }
  0x13   : > { %p1197_p3 = scmp.lt.s32.totalorder %s157_s29, %s157_s29  ;;  %p1198_p4 = scmp.lt.s32.totalorder %s1189_s7, %s1189_s7 }
  0x14   : > { %p1180_p13 = pneg %p1389_p12 }
  0x15   : > { %p1199_p7 = por %p1198_p4, %p1197_p3 }
  0x16   : > { %p1192_p1 = pnand %p1190_p0, %p1180_p13 }
  0x18   : > { %p1193_p2 = pneg %p1192_p1 }
  0x1a   : > { %p1200_p8 = pnand %p1199_p7, %p1193_p2 }
  0x1c   : > { %1203 = shalt.err (!%p1200_p8)
}
  0x1d   : > { %s1302_s8 = smov 640   ;;  %s1303_s9 = smov 40  }
  0x1e   : > { %1119 = dma.hbm_to_vmem [thread:$0]  (!%p1389_p12), %s1564_s2, 10240, %s157_s29, [#allocation3], %s1302_s8, %s1302_s8, %s1303_s9  }
  0x1f   : > { %s1215_s12 = scalar_lea.vmem %s171_s6, 128  ;;  %p1223_p9 = scmp.lt.s32.totalorder %s171_s6, %s171_s6 }
  0x20   : > { %p1216_p11 = scmp.ne.s32.totalorder %s171_s6, %s1215_s12  ;;  %p1224_p6 = scmp.lt.s32.totalorder %s1215_s12, %s1215_s12 }
  0x22   : > { %p1218_p0 = pnand %p1216_p11, %p1180_p13  ;;  %p1225_p3 = por %p1224_p6, %p1223_p9 }
  0x24   : > { %p1219_p1 = pneg %p1218_p0 }
  0x26   : > { %p1226_p2 = pnand %p1225_p3, %p1219_p1 }
  0x28   : > { %1229 = shalt.err (!%p1226_p2)
}
  0x29   : > { %1122 = dma.hbm_to_vmem [thread:$0]  (!%p1389_p12), %s1565_s3, 128, %s171_s6, [#allocation6]  }
  0x2a   : > { %196 = sbr.rel (%p1381_p10) target bundleno = 1577 (0x629), region = 36  ;;  %p1572_p4 = scmp.eq.s32.totalorder (!%p1381_p10), %s1353_s19, 0 }
  0x2f   : > { %1273 = dma.done.wait (%p1572_p4), [#allocation3], 10240   ;;  %p1573_p13 = pmov %p1572_p4 }
  0x30   : > { %p1574_p7 = pmov %p1572_p4 }
  0x31   : > { %1275 = vsyncadd (%p1573_p13), [#allocation3], 4294957056 }
  0x32   : > { %1277 = dma.done.wait (%p1574_p7), [#allocation6], 128   ;;  %p1575_p6 = pmov %p1572_p4 }
  0x33   : > { %v1304_v0 = vmov 0.0   ;;  %v291_v1 = vld [vmem:[#allocation2 + $0x260] sm:$0xff]  ;;  %v290_v2 = vld [vmem:[#allocation2 + $0x258] sm:$0xff]  ;;  %v287_v4 = vld [vmem:[#allocation2 + $0x230] sm:$0xff]  ;;  %p228_p9 = scmp.lt.s32.totalorder %s1353_s19, 1  ;;  %vm1305_vm0 = vmmov 0   ;;  %v434_v36 = vlaneseq }
  0x34   : > { %1279 = vsyncadd (%p1575_p6), [#allocation6], 4294967168  ;;  %357 = vmatprep.mubr.f32.mxu0 %v1304_v0  ;;  %991 = vmatprep.subr.mxu1 %v1304_v0  ;;  %v288_v3 = vld [vmem:[#allocation2 + $0x238] sm:$0xff]  ;;  %v285_v5 = vld [vmem:[#allocation2 + $0x210] sm:$0xff]  ;;  %vm519_vm1 = vcmask 64512   ;;  %s225_s6 = sand.u32 1, %s1290_s16  }
  0x35   : > { %293 = vmatprep.subr.mxu0 %v291_v1  ;;  %v284_v6 = vld [vmem:[#allocation2 + $0x208] sm:$0xff]  ;;  %v281_v8 = vld [vmem:[#allocation2 + $0x1e0] sm:$0xff]  ;;  %v278_v10 = vld [vmem:[#allocation2 + $0x1b8] sm:$0xff]  ;;  %s229_s20 = scalar_select %p228_p9, %s1353_s19, 1  ;;  %1023 = vmatprep.mubr.msk.f32.mxu1 %vm1305_vm0, %v1304_v0  ;;  %v1439_v37 = vshrl.u32 %v434_v36, 7 }
  0x36   : > { %294 = vmatpush1.msra.mxu0 %v290_v2  ;;  %v282_v7 = vld [vmem:[#allocation2 + $0x1e8] sm:$0xff]  ;;  %v279_v9 = vld [vmem:[#allocation2 + $0x1c0] sm:$0xff]  ;;  %v276_v11 = vld [vmem:[#allocation2 + $0x198] sm:$0xff]  ;;  %s927_s7 = sshll.u32 %s225_s6, 3  ;;  %s933_s8 = sshll.u32 %s1353_s19, 7 }
  0x37   : > { %295 = vmatprep.subr.mxu0 %v288_v3  ;;  %v275_v12 = vld [vmem:[#allocation2 + $0x190] sm:$0xff]  ;;  %v272_v14 = vld [vmem:[#allocation2 + $0x168] sm:$0xff]  ;;  %v269_v16 = vld [vmem:[#allocation2 + $0x140] sm:$0xff]  ;;  %s928_s22 = sshll.u32 %s229_s20, 3  ;;  %s234_s5 = scalar_lea.vmem %s1563_s1, %s229_s20  ;;  %v441_v38 = vsub.s32 1, %v1439_v37  ;;  %v436_v40 = vsub.s32 0, %v1439_v37 }
  0x38   : > { %296 = vmatpush1.msra.mxu0 %v287_v4  ;;  %v273_v13 = vld [vmem:[#allocation2 + $0x170] sm:$0xff]  ;;  %v270_v15 = vld [vmem:[#allocation2 + $0x148] sm:$0xff]  ;;  %v267_v17 = vld [vmem:[#allocation2 + $0x120] sm:$0xff]  ;;  %s231_s28 = scalar_lea.vmem %s1562_s0, %s928_s22  ;;  %s227_s9 = scalar_lea.vmem [#allocation7], %s927_s7 }
  0x39   : > { %297 = vmatprep.subr.mxu0 %v285_v5  ;;  %v266_v18 = vld [vmem:[#allocation2 + $0x118] sm:$0xff]  ;;  %v263_v20 = vld [vmem:[#allocation2 + $0xf0] sm:$0xff]  ;;  %v260_v22 = vld [vmem:[#allocation2 + $0xc8] sm:$0xff]  ;;  %s829_s10 = sshll.u32 %s227_s9, 4  ;;  %s1527_s13 = scalar_lea.hbm %s1566_s4, %s933_s8  ;;  %s830_s10 = int_to_ptr.vmem [resolvable:$true] %s829_s10 }
  0x3a   : > { %298 = vmatpush1.msra.mxu0 %v284_v6  ;;  %v264_v19 = vld [vmem:[#allocation2 + $0xf8] sm:$0xff]  ;;  %v261_v21 = vld [vmem:[#allocation2 + $0xd0] sm:$0xff]  ;;  %v258_v23 = vld [vmem:[#allocation2 + $0xa8] sm:$0xff]  ;;  %s816_s14 = scalar_lea.sflag [#allocation4], %s225_s6  ;;  %s1230_s20 = scalar_lea.vmem %s830_s10, 128 }
  0x3b   : > { %299 = vmatprep.subr.mxu0 %v282_v7  ;;  %v257_v24 = vld [vmem:[#allocation2 + $0xa0] sm:$0xff]  ;;  %v254_v26 = vld [vmem:[#allocation2 + $0x78] sm:$0xff]  ;;  %v251_v28 = vld [vmem:[#allocation2 + $0x50] sm:$0xff]  ;;  %p1231_p10 = scmp.ne.s32.totalorder %s830_s10, %s1230_s20  ;;  %s1306_s22 = smov [#allocation7]  }
  0x3c   : > { %300 = vmatpush1.msra.mxu0 %v281_v8  ;;  %v255_v25 = vld [vmem:[#allocation2 + $0x80] sm:$0xff]  ;;  %v252_v27 = vld [vmem:[#allocation2 + $0x58] sm:$0xff]  ;;  %v249_v29 = vld [vmem:[#allocation2 + $0x30] sm:$0xff]  ;;  %s1234_s19 = sshll.u32 %s1306_s22, 4  ;;  %s1235_s19 = int_to_ptr.vmem [resolvable:$false] %s1234_s19 }
  0x3d   : > { %301 = vmatprep.subr.mxu0 %v279_v9  ;;  %v236_v30 = vld [vmem:[%s231_s28] sm:$0xff]  ;;  %v248_v32 = vld [vmem:[#allocation2 + $0x28] sm:$0xff]  ;;  %v286_v49 = vld [vmem:[#allocation2 + $0x218] sm:$0xff]  ;;  %v446_v9 = vsub.s32 2, %v1439_v37  ;;  %p1232_p12 = pnand %p1231_p10, %p1370_p5  ;;  %s1236_s23 = scalar_lea.vmem %s1235_s19, 256 }
  0x3e   : > { %302 = vmatpush1.msra.mxu0 %v278_v10  ;;  %v929_v31 = vld [vmem:[%s234_s5] ss:$0 sm:$0xff]  ;;  %v246_v33 = vld [vmem:[#allocation2 + $0x8] sm:$0xff]  ;;  %v283_v50 = vld [vmem:[#allocation2 + $0x1f0] sm:$0xff]  ;;  %p1237_p11 = scmp.lt.s32.totalorder %s830_s10, %s1235_s19  ;;  %p1238_p0 = scmp.lt.s32.totalorder %s1236_s23, %s1230_s20 }
  0x3f   : > { %303 = vmatprep.subr.mxu0 %v276_v11  ;;  %v245_v34 = vld [vmem:[#allocation2] sm:$0xff]  ;;  %v1431_v35 = vadd.f32 %v929_v31, %v236_v30  ;;  %v292_v47 = vld [vmem:[#allocation2 + $0x268] sm:$0xff]  ;;  %v274_v53 = vld [vmem:[#allocation2 + $0x178] sm:$0xff]  ;;  %p1233_p8 = pneg %p1232_p12 }
  0x40   : > { %304 = vmatpush1.msra.mxu0 %v275_v12  ;;  %v1442_v39 = vld [vmem:[#allocation5] sm:$0xff]  ;;  %992 = vmatpush3.msra.mxu1 %v292_v47  ;;  %v280_v51 = vld [vmem:[#allocation2 + $0x1c8] sm:$0xff]  ;;  %v271_v54 = vld [vmem:[#allocation2 + $0x150] sm:$0xff]  ;;  %p1239_p1 = por %p1238_p0, %p1237_p11 }
  0x41   : > { %305 = vmatprep.subr.mxu0 %v273_v13  ;;  %v442_v41 = vrot.slane %v1442_v39, %v441_v38  ;;  %v437_v43 = vrot.slane %v1442_v39, %v436_v40  ;;  %v289_v48 = vld [vmem:[#allocation2 + $0x240] sm:$0xff]  ;;  %993 = vmatprep.subr.mxu1 %v1304_v0  ;;  %v268_v55 = vld [vmem:[#allocation2 + $0x128] sm:$0xff]  ;;  %v262_v57 = vld [vmem:[#allocation2 + $0xd8] sm:$0xff]  ;;  %v447_v10 = vrot.slane %v1442_v39, %v446_v9  ;;  %v721_v9 = vsub.s32 5, %v1439_v37 }
  0x42   : > { %306 = vmatpush1.msra.mxu0 %v272_v14  ;;  %994 = vmatpush3.msra.mxu1 %v289_v48  ;;  %v277_v52 = vld [vmem:[#allocation2 + $0x1a0] sm:$0xff]  ;;  %v259_v58 = vld [vmem:[#allocation2 + $0xb0] sm:$0xff]  ;;  %v256_v59 = vld [vmem:[#allocation2 + $0x88] sm:$0xff]  ;;  %p1240_p3 = pnand %p1239_p1, %p1233_p8 }
  0x43   : > { %307 = vmatprep.subr.mxu0 %v270_v15  ;;  %995 = vmatprep.subr.mxu1 %v1304_v0  ;;  %v265_v56 = vld [vmem:[#allocation2 + $0x100] sm:$0xff]  ;;  %v250_v61 = vld [vmem:[#allocation2 + $0x38] sm:$0xff]  ;;  %v247_v62 = vld [vmem:[#allocation2 + $0x10] sm:$0xff] }
  0x44   : > { %308 = vmatpush1.msra.mxu0 %v269_v16  ;;  %996 = vmatpush3.msra.mxu1 %v286_v49  ;;  %v253_v60 = vld [vmem:[#allocation2 + $0x60] sm:$0xff]  ;;  %v619_v13 = vld [vmem:[#allocation2 + $0x270] sm:$0xff]  ;;  %v618_v14 = vld [vmem:[#allocation2 + $0x248] sm:$0xff] }
  0x45   : > { %309 = vmatprep.subr.mxu0 %v267_v17  ;;  %997 = vmatprep.subr.mxu1 %v1304_v0  ;;  %v617_v15 = vld [vmem:[#allocation2 + $0x220] sm:$0xff]  ;;  %v616_v16 = vld [vmem:[#allocation2 + $0x1f8] sm:$0xff]  ;;  %v615_v17 = vld [vmem:[#allocation2 + $0x1d0] sm:$0xff] }
  0x46   : > { %310 = vmatpush1.msra.mxu0 %v266_v18  ;;  %998 = vmatpush3.msra.mxu1 %v283_v50  ;;  %v614_v18 = vld [vmem:[#allocation2 + $0x1a8] sm:$0xff]  ;;  %v604_v31 = vld [vmem:[#allocation2 + $0x18] sm:$0xff]  ;;  %v738_v49 = vld [vmem:[#allocation2 + $0x250] sm:$0xff] }
  0x47   : > { %311 = vmatprep.subr.mxu0 %v264_v19  ;;  %999 = vmatprep.subr.mxu1 %v1304_v0  ;;  %v613_v19 = vld [vmem:[#allocation2 + $0x180] sm:$0xff]  ;;  %v739_v48 = vld [vmem:[#allocation2 + $0x278] sm:$0xff]  ;;  %v737_v50 = vld [vmem:[#allocation2 + $0x228] sm:$0xff] }
  0x48   : > { %312 = vmatpush1.msra.mxu0 %v263_v20  ;;  %1000 = vmatpush3.msra.mxu1 %v280_v51  ;;  %v612_v20 = vld [vmem:[#allocation2 + $0x158] sm:$0xff] }
  0x49   : > { %313 = vmatprep.subr.mxu0 %v261_v21  ;;  %1001 = vmatprep.subr.mxu1 %v1304_v0  ;;  %v611_v21 = vld [vmem:[#allocation2 + $0x130] sm:$0xff]  ;;  %v735_v51 = vld [vmem:[#allocation2 + $0x1d8] sm:$0xff] }
  0x4a   : > { %314 = vmatpush1.msra.mxu0 %v260_v22  ;;  %1002 = vmatpush3.msra.mxu1 %v277_v52  ;;  %v610_v22 = vld [vmem:[#allocation2 + $0x108] sm:$0xff]  ;;  %v734_v52 = vld [vmem:[#allocation2 + $0x1b0] sm:$0xff] }
  0x4b   : > { %315 = vmatprep.subr.mxu0 %v258_v23  ;;  %1003 = vmatprep.subr.mxu1 %v1304_v0  ;;  %v609_v23 = vld [vmem:[#allocation2 + $0xe0] sm:$0xff] }
  0x4c   : > { %316 = vmatpush1.msra.mxu0 %v257_v24  ;;  %1004 = vmatpush3.msra.mxu1 %v274_v53  ;;  %v608_v24 = vld [vmem:[#allocation2 + $0xb8] sm:$0xff]  ;;  %v733_v53 = vld [vmem:[#allocation2 + $0x188] sm:$0xff] }
  0x4d   : > { %317 = vmatprep.subr.mxu0 %v255_v25  ;;  %1005 = vmatprep.subr.mxu1 %v1304_v0  ;;  %v607_v25 = vld [vmem:[#allocation2 + $0x90] sm:$0xff] }
  0x4e   : > { %318 = vmatpush1.msra.mxu0 %v254_v26  ;;  %1006 = vmatpush3.msra.mxu1 %v271_v54  ;;  %v606_v26 = vld [vmem:[#allocation2 + $0x68] sm:$0xff]  ;;  %v732_v54 = vld [vmem:[#allocation2 + $0x160] sm:$0xff] }
  0x4f   : > { %319 = vmatprep.subr.mxu0 %v252_v27  ;;  %1007 = vmatprep.subr.mxu1 %v1304_v0  ;;  %v605_v27 = vld [vmem:[#allocation2 + $0x40] sm:$0xff] }
  0x50   : > { %320 = vmatpush1.msra.mxu0 %v251_v28  ;;  %1008 = vmatpush3.msra.mxu1 %v268_v55  ;;  %v731_v55 = vld [vmem:[#allocation2 + $0x138] sm:$0xff] }
  0x51   : > { %321 = vmatprep.subr.mxu0 %v249_v29  ;;  %1009 = vmatprep.subr.mxu1 %v1304_v0 }
  0x52   : > { %322 = vmatpush1.msra.mxu0 %v248_v32  ;;  %1010 = vmatpush3.msra.mxu1 %v265_v56  ;;  %v730_v56 = vld [vmem:[#allocation2 + $0x110] sm:$0xff] }
  0x53   : > { %323 = vmatprep.subr.mxu0 %v246_v33  ;;  %1011 = vmatprep.subr.mxu1 %v1304_v0 }
  0x54   : > { %324 = vmatpush1.msra.mxu0 %v245_v34  ;;  %1012 = vmatpush3.msra.mxu1 %v262_v57  ;;  %v622_v34 = vsub.s32 3, %v1439_v37  ;;  %v729_v57 = vld [vmem:[#allocation2 + $0xe8] sm:$0xff] }
  0x55   : > { %358 = vmatmul.mubr.f32.vlgmr.msra.gmra.mxu0 %v1431_v35  ;;  %1026 = vmatprep.subr.mxu0 %v1304_v0 }
  0x56   : > { %1028 = vmatprep.mubr.msk.f32.mxu0 %vm1305_vm0, %v1304_v0  ;;  %1013 = vmatprep.subr.mxu1 %v1304_v0  ;;  %v623_v36 = vrot.slane %v1442_v39, %v622_v34 }
  0x57   : > { %1014 = vmatpush3.msra.mxu1 %v259_v58  ;;  %v728_v58 = vld [vmem:[#allocation2 + $0xc0] sm:$0xff] }
  0x58   : > { %1015 = vmatprep.subr.mxu1 %v1304_v0 }
  0x59   : > { %1016 = vmatpush3.msra.mxu1 %v256_v59  ;;  %v727_v59 = vld [vmem:[#allocation2 + $0x98] sm:$0xff] }
  0x5a   : > { %1017 = vmatprep.subr.mxu1 %v1304_v0 }
  0x5b   : > { %1018 = vmatpush3.msra.mxu1 %v253_v60  ;;  %v726_v60 = vld [vmem:[#allocation2 + $0x70] sm:$0xff] }
  0x5c   : > { %1019 = vmatprep.subr.mxu1 %v1304_v0 }
  0x5d   : > { %1020 = vmatpush3.msra.mxu1 %v250_v61  ;;  %v725_v61 = vld [vmem:[#allocation2 + $0x48] sm:$0xff] }
  0x5e   : > { %1021 = vmatprep.subr.mxu1 %v1304_v0 }
  0x5f   : > { %1022 = vmatpush3.msra.mxu1 %v247_v62  ;;  %v724_v62 = vld [vmem:[#allocation2 + $0x20] sm:$0xff] }
  0x60   : > { %1024 = vmatmul.mubr.f32.vlgmr.msra.gmra.mxu1 %v1431_v35  ;;  %1031 = vmatprep.subr.mxu1 %v1304_v0 }
  0x61   : > { %1033 = vmatprep.mubr.msk.f32.mxu1 %vm1305_vm0, %v1304_v0 }
 0x115   : > { %v359_v42 = vpop.f32.mrf.mxu0 }
 0x116   : > { %v438_v46 = vadd.f32 %v437_v43, %v359_v42 }
 0x117   : > { %v361_v44 = vpop.f32.mrf.mxu0 }
 0x118   : > { %v443_v45 = vadd.f32 %v442_v41, %v361_v44 }
 0x11a   : > { %1027 = vmatpush3.xpose.msra.mxu0 %v443_v45 }
 0x11b   : > { %1036 = vmatprep.subr.mxu0 %v1304_v0 }
 0x11d   : > { %1029 = vmatmul.mubr.f32.vlgmr.msra.gmra.mxu0 %v438_v46 }
 0x11e   : > { %1068 = vmatprep.mubr.msk.f32.mxu0 %vm1305_vm0, %v1304_v0  ;;  %1037 = vmatpush3.msra.mxu0 %v619_v13  ;;  %v722_v13 = vrot.slane %v1442_v39, %v721_v9 }
 0x11f   : > { %1038 = vmatprep.subr.mxu0 %v1304_v0 }
 0x120   : > { %v430_v8 = vpop.f32.mrf.mxu1  ;;  %1039 = vmatpush3.msra.mxu0 %v618_v14 }
 0x121   : > { %v448_v12 = vadd.f32 %v447_v10, %v430_v8  ;;  %1040 = vmatprep.subr.mxu0 %v1304_v0  ;;  %v716_v8 = vsub.s32 4, %v1439_v37 }
 0x122   : > { %v1025_v11 = vpop.f32.mrf.mxu1  ;;  %1041 = vmatpush3.msra.mxu0 %v617_v15 }
 0x123   : > { %1032 = vmatpush3.msra.mxu1 %v448_v12  ;;  %1042 = vmatprep.subr.mxu0 %v1304_v0 }
 0x124   : > { %1071 = vmatprep.subr.mxu1 %v1304_v0  ;;  %1043 = vmatpush3.msra.mxu0 %v616_v16  ;;  %v742_v16 = vsub.s32 6, %v1439_v37 }
 0x125   : > { %1044 = vmatprep.subr.mxu0 %v1304_v0 }
 0x126   : > { %1045 = vmatpush3.msra.mxu0 %v615_v17  ;;  %v743_v17 = vrot.slane %v1442_v39, %v742_v16 }
 0x127   : > { %1046 = vmatprep.subr.mxu0 %v1304_v0 }
 0x128   : > { %1047 = vmatpush3.msra.mxu0 %v614_v18 }
 0x129   : > { %1048 = vmatprep.subr.mxu0 %v1304_v0 }
 0x12a   : > { %1049 = vmatpush3.msra.mxu0 %v613_v19 }
 0x12b   : > { %1050 = vmatprep.subr.mxu0 %v1304_v0 }
 0x12c   : > { %1051 = vmatpush3.msra.mxu0 %v612_v20 }
 0x12d   : > { %1052 = vmatprep.subr.mxu0 %v1304_v0 }
 0x12e   : > { %1053 = vmatpush3.msra.mxu0 %v611_v21 }
 0x12f   : > { %1054 = vmatprep.subr.mxu0 %v1304_v0 }
 0x130   : > { %1055 = vmatpush3.msra.mxu0 %v610_v22 }
 0x131   : > { %1056 = vmatprep.subr.mxu0 %v1304_v0 }
 0x132   : > { %1057 = vmatpush3.msra.mxu0 %v609_v23 }
 0x133   : > { %1058 = vmatprep.subr.mxu0 %v1304_v0 }
 0x134   : > { %1059 = vmatpush3.msra.mxu0 %v608_v24 }
 0x135   : > { %1060 = vmatprep.subr.mxu0 %v1304_v0 }
 0x136   : > { %1061 = vmatpush3.msra.mxu0 %v607_v25 }
 0x137   : > { %1062 = vmatprep.subr.mxu0 %v1304_v0 }
 0x138   : > { %1063 = vmatpush3.msra.mxu0 %v606_v26 }
 0x139   : > { %1064 = vmatprep.subr.mxu0 %v1304_v0 }
 0x13a   : > { %1065 = vmatpush3.msra.mxu0 %v605_v27 }
 0x13b   : > { %1066 = vmatprep.subr.mxu0 %v1304_v0 }
 0x13c   : > { %1067 = vmatpush3.msra.mxu0 %v604_v31 }
 0x1dd   : > { %v515_v63 = vpop.f32.mrf.mxu0 }
 0x1de   : > { %v520_v1 = vsel %vm519_vm1, %v515_v63, -inf }
 0x1df   : > { %521 = vmax.xlane.f32.xlu0 %v520_v1  ;;  %v1030_v2 = vpop.f32.mrf.mxu0 }
 0x268   : > { %v522_v3 = vpop.xlane.xlu0 %521 }
 0x269   : > { %v523_v4 = vsub.f32 %v515_v63, %v522_v3 }
 0x26b   : > { %v524_v5 = vmul.f32 1.442695, %v523_v4 }
 0x26d   : > { %1170 = vpow2.f32 %v524_v5 }
 0x27a   : > { %v1171_v6 = vpop.eup %1170 }
 0x27b   : > { %v526_v7 = vsel %vm519_vm1, %v1171_v6, 0.0 }
 0x27c   : > { %527 = vadd.xlane.f32.xlu0 %v526_v7 }
 0x305   : > { %v528_v28 = vpop.xlane.xlu0 %527 }
 0x306   : > { %1172 = vrcp.f32 %v528_v28 }
 0x313   : > { %v1173_v29 = vpop.eup %1172 }
 0x314   : > { %v530_v30 = vmul.f32 %v1173_v29, %v1171_v6 }
 0x316   : > { %1034 = vmatmul.mubr.msk.f32.vlgmr.msra.gmra.mxu1 %vm519_vm1, %v530_v30 }
 0x317   : > { %1103 = vmatprep.mubr.msk.f32.mxu1 %vm1305_vm0, %v1304_v0  ;;  %1072 = vmatpush3.msra.mxu1 %v739_v48 }
 0x318   : > { %1073 = vmatprep.subr.mxu1 %v1304_v0 }
 0x319   : > { %1074 = vmatpush3.msra.mxu1 %v738_v49 }
 0x31a   : > { %1075 = vmatprep.subr.mxu1 %v1304_v0 }
 0x31b   : > { %1076 = vmatpush3.msra.mxu1 %v737_v50 }
 0x31c   : > { %1077 = vmatprep.subr.mxu1 %v1304_v0 }
 0x3d6   : > { %v600_v32 = vpop.f32.mrf.mxu1 }
 0x3d7   : > { %1069 = vmatmul.mubr.f32.vlgmr.msra.gmra.mxu0 %v600_v32 }
 0x3d8   : > { %v1035_v33 = vpop.f32.mrf.mxu1 }
 0x497   : > { %v690_v38 = vpop.f32.mrf.mxu0 }
 0x498   : > { %v691_v40 = vadd.f32 %v690_v38, %v623_v36 }
 0x499   : > { %v1070_v41 = vpop.f32.mrf.mxu0 }
 0x49a   : > { %v695_v42 = vmul.f32 1.442695, %v691_v40  ;;  %vm694_vm2 = vcmp.gt.f32.partialorder %v691_v40, 0.0 }
 0x49c   : > { %1174 = vpow2.f32 %v695_v42 }
 0x4a9   : > { %v1175_v43 = vpop.eup %1174 }
 0x4aa   : > { %v931_v44 = vadd.f32 -1.0, %v1175_v43 }
 0x4ac   : > { %v698_v45 = vsel %vm694_vm2, %v691_v40, %v931_v44 }
 0x4ad   : > { %v1495_v46 = vadd.f32 %v698_v45, %v1431_v35  ;;  %v736_v35 = vld [vmem:[#allocation2 + $0x200] sm:$0xff] }
 0x4ae   : > { %1078 = vmatpush3.msra.mxu1 %v736_v35 }
 0x4af   : > { %700 = vadd.xlane.f32.xlu1 %v1495_v46  ;;  %v703_v47 = vmul.f32 %v1495_v46, %v1495_v46  ;;  %1079 = vmatprep.subr.mxu1 %v1304_v0 }
 0x4b0   : > { %1080 = vmatpush3.msra.mxu1 %v735_v51 }
 0x4b1   : > { %1081 = vmatprep.subr.mxu1 %v1304_v0 }
 0x4b2   : > { %1082 = vmatpush3.msra.mxu1 %v734_v52 }
 0x4b3   : > { %704 = vadd.xlane.f32.xlu1 %v703_v47  ;;  %1083 = vmatprep.subr.mxu1 %v1304_v0 }
 0x4b4   : > { %1084 = vmatpush3.msra.mxu1 %v733_v53 }
 0x4b5   : > { %1085 = vmatprep.subr.mxu1 %v1304_v0 }
 0x4b6   : > { %1086 = vmatpush3.msra.mxu1 %v732_v54 }
 0x4b7   : > { %1087 = vmatprep.subr.mxu1 %v1304_v0 }
 0x4b8   : > { %1088 = vmatpush3.msra.mxu1 %v731_v55 }
 0x4b9   : > { %1089 = vmatprep.subr.mxu1 %v1304_v0 }
 0x4ba   : > { %1090 = vmatpush3.msra.mxu1 %v730_v56 }
 0x4bb   : > { %1091 = vmatprep.subr.mxu1 %v1304_v0 }
 0x4bc   : > { %1092 = vmatpush3.msra.mxu1 %v729_v57 }
 0x4bd   : > { %1093 = vmatprep.subr.mxu1 %v1304_v0 }
 0x4be   : > { %1094 = vmatpush3.msra.mxu1 %v728_v58 }
 0x4bf   : > { %1095 = vmatprep.subr.mxu1 %v1304_v0 }
 0x4c0   : > { %1096 = vmatpush3.msra.mxu1 %v727_v59 }
 0x4c1   : > { %1097 = vmatprep.subr.mxu1 %v1304_v0 }
 0x4c2   : > { %1098 = vmatpush3.msra.mxu1 %v726_v60 }
 0x4c3   : > { %1099 = vmatprep.subr.mxu1 %v1304_v0 }
 0x4c4   : > { %1100 = vmatpush3.msra.mxu1 %v725_v61 }
 0x4c5   : > { %1101 = vmatprep.subr.mxu1 %v1304_v0  ;;  %v717_v0 = vrot.slane %v1442_v39, %v716_v8 }
 0x4c6   : > { %1102 = vmatpush3.msra.mxu1 %v724_v62 }
 0x538   : > { %v701_v63 = vpop.xlane.xlu1 %700 }
 0x539   : > { %v702_v1 = vmul.f32 0.03125, %v701_v63 }
 0x53b   : > { %v707_v3 = vmul.f32 %v702_v1, %v702_v1  ;;  %v710_v10 = vsub.f32 %v1495_v46, %v702_v1 }
 0x53c   : > { %v705_v2 = vpop.xlane.xlu1 %704 }
 0x53d   : > { %v706_v4 = vmul.f32 0.03125, %v705_v2 }
 0x53f   : > { %v708_v5 = vsub.f32 %v706_v4, %v707_v3 }
 0x541   : > { %v709_v6 = vmax.f32 %v708_v5, 0.0 }
 0x543   : > { %v711_v7 = vadd.f32 1e-05, %v709_v6 }
 0x545   : > { %1176 = vrsqrt.f32 %v711_v7 }
 0x552   : > { %v1177_v11 = vpop.eup %1176 }
 0x553   : > { %v713_v12 = vmul.f32 %v1177_v11, %v710_v10 }
 0x555   : > { %v718_v14 = vmul.f32 %v717_v0, %v713_v12 }
 0x557   : > { %v723_v15 = vadd.f32 %v722_v13, %v718_v14 }
 0x559   : > { %1104 = vmatmul.mubr.f32.vlgmr.msra.gmra.mxu1 %v723_v15 }
 0x619   : > { %v810_v18 = vpop.f32.mrf.mxu1 }
 0x61a   : > { %v811_v19 = vadd.f32 %v810_v18, %v743_v17 }
 0x61b   : > { %v1105_v20 = vpop.f32.mrf.mxu1 }
 0x61c   : > { %814 = vst [vmem:[%s227_s9] sm:$0xff] %v811_v19 }
 0x61d   : > { %1243 = shalt.err (!%p1240_p3)
}
 0x61e   : > { %s1244_s27 = scalar_lea.hbm %s1527_s13, 128  ;;  %s1248_s30 = scalar_lea.hbm %s1566_s4, 256 }
 0x61f   : > { %p1245_p2 = scmp.ne.s32.totalorder %s1527_s13, %s1244_s27  ;;  %p1249_p7 = scmp.lt.s32.totalorder %s1527_s13, %s1566_s4 }
 0x620   : > { %p1250_p6 = scmp.lt.s32.totalorder %s1248_s30, %s1244_s27 }
 0x621   : > { %p1246_p4 = pnand %p1245_p2, %p1370_p5 }
 0x622   : > { %p1251_p9 = por %p1250_p6, %p1249_p7 }
 0x623   : > { %p1247_p13 = pneg %p1246_p4 }
 0x625   : > { %p1252_p10 = pnand %p1251_p9, %p1247_p13 }
 0x627   : > { %1255 = shalt.err (!%p1252_p10)
}
 0x628   : > { %1114 = dma.vmem_to_hbm [thread:$0]  (%p1370_p5), %s830_s10, 128, %s1527_s13, %s816_s14  }
 0x629 PF: > { %p1131_p12 = scmp.ge.s32.totalorder %s1298_s18, 2  ;;  %s841_s7 = sand.u32 1, %s1286_s15  }
 0x62a   : > { %p1576_p8 = scmp.ne.s32.totalorder %s1569_s26, 0  ;;  %s842_s8 = scalar_lea.sflag [#allocation4], %s841_s7 }
 0x62c   : > { %p1124_p11 = pnand %p1131_p12, %p1576_p8 }
 0x62e   : > { %p1125_p0 = pneg %p1124_p11 }
 0x630   : > { %1281 = dma.done.wait (%p1125_p0), %s842_s8, 128  }
 0x631   : > { %1283 = vsyncadd (%p1125_p0), %s842_s8, 4294967168  ;;  %p16_p1 = scmp.ge.s32.totalorder %s1357_s21, 4   ;;  %s1577_s15 = smov %s1290_s16 }
 0x632   : > { %s1578_s16 = smov %s1294_s17  ;;  %s1579_s17 = smov %s1368_s24 }
 0x633   : > { %s1580_s18 = smov %s1357_s21  ;;  %18 = sbr.rel (!%p16_p1) target bundleno = 5 (0x5), region = 83 }
 0x638   :  { %847 = vsyncpa [#allocation3], 1 }
 0x639   :  { %849 = vsyncpa [#allocation3 + $0x1], 1 }
 0x63a   :  { %850 = vsyncpa [#allocation6], 1 }
 0x63b   :  { %851 = vsyncpa [#allocation4], 1 }
 0x63c   :  { %853 = vsyncpa [#allocation4 + $0x1], 1 }

</bundles_post_ra>
